<compile_context>
chip_gen: v7x
topology: tpu7x:2x2x1
jax: 0.10.0
libtpu: 0.0.40
codegen_flags: <defaults>
</compile_context>

<pallas_src>
import jax
import jax.numpy as jnp
from jax.experimental import pallas as pl
from jax.experimental.pallas import tpu as pltpu


def _round_up(a, m):
    return -(-a // m) * m


def _make_svr_kernel(metric, gamma, coef0, degree, fold_rbf):
    """Kernel body specialized (at trace time) on the static kernel metric."""
    deg = float(degree)
    int_deg = deg.is_integer() and 0.0 <= deg <= 64.0
    # Only the non-integer-degree poly path can produce NaN on zero-padded
    # support-vector columns (base = coef0 < 0); guard those with their
    # (zero) dual coefficient so padding never contaminates real outputs.
    needs_pad_guard = (metric in ("poly", "polynomial")) and not int_deg

    def kernel(x_ref, svt_ref, svn_ref, alpha_ref, b_ref, out_ref):
        m_idx = pl.program_id(1)

        # Accumulator init (output block is resident across the M axis).
        @pl.when(m_idx == 0)
        def _init():
            out_ref[...] = jnp.zeros_like(out_ref) + b_ref[0]

        x = x_ref[...]                                            # (TN, D)
        # Match MXU operand dtype to the (possibly bf16) support vectors;
        # accumulation stays f32 via preferred_element_type.
        x_mm = x.astype(svt_ref.dtype)
        dots = jnp.dot(x_mm, svt_ref[...],
                       preferred_element_type=jnp.float32)        # (TN, TM)

        if metric == "linear":
            k = dots
        elif metric in ("poly", "polynomial"):
            base = gamma * dots + coef0
            if int_deg:
                d = int(deg)
                if d == 0:
                    k = jnp.ones_like(base)                       # x**0 == 1 (torch)
                else:
                    # exponentiation by squaring: <= 2*log2(d) vmuls
                    acc = None
                    sq = base
                    e = d
                    while e:
                        if e & 1:
                            acc = sq if acc is None else acc * sq
                        e >>= 1
                        if e:
                            sq = sq * sq
                    k = acc
            else:
                # non-integer degree: pow via exp/log (NaN for negative base,
                # matching torch's (neg) ** float behaviour).
                k = jnp.exp(deg * jnp.log(base))
        elif metric == "rbf":
            xf = x.astype(jnp.float32)
            if fold_rbf:
                # svt pre-scaled by 2*gamma, svn pre-scaled by -gamma (host).
                # exp(min(2g*x.sv - g*||sv||^2 - g*||x||^2, 0))
                #   == exp(-g * max(||x||^2 + ||sv||^2 - 2 x.sv, 0))   [g > 0]
                xnorm_neg = (-gamma) * jnp.sum(xf * xf, axis=-1, keepdims=True)
                k = jnp.exp(jnp.minimum(dots + svn_ref[...] + xnorm_neg, 0.0))
            else:
                x_norm = jnp.sum(xf * xf, axis=-1, keepdims=True)
                dists = jnp.maximum(x_norm + svn_ref[...] - 2.0 * dots, 0.0)
                k = jnp.exp(-gamma * dists)
        elif metric == "sigmoid":
            k = jnp.tanh(gamma * dots + coef0)
        else:
            raise ValueError(f"unsupported kernel metric: {metric}")

        # einsum('jk,jk->j', dual_coef, K): lane-major (1, TM) coefficients,
        # VPU multiply + XLU lane reduction (no 1-wide MXU matvec).
        a_row = alpha_ref[...]                                    # (1, TM)
        contrib = k * a_row
        if needs_pad_guard:
            contrib = jnp.where(a_row == 0.0, 0.0, contrib)
        out_ref[...] += jnp.sum(contrib, axis=-1, keepdims=True)  # (TN, 1)

    return kernel


def torch_svr_predict(x, support_vectors, dual_coef, intercept, *,
                      metric="rbf", gamma=None, coef0=None, degree=None,
                      tile_n=None, tile_m=None, use_bf16=False):
    """x: (N, D). support_vectors: (M, D). dual_coef: (1, M) or (M,). intercept: (1,)."""
    if metric not in ("linear", "poly", "polynomial", "rbf", "sigmoid"):
        raise ValueError(f"unsupported kernel metric: {metric}")

    N, D = x.shape
    M = support_vectors.shape[0]

    # Hyperparameter defaults exactly as in sk2torch's Kernel module.
    g = float(gamma) if gamma is not None else 1.0 / D
    c0 = float(coef0) if coef0 is not None else 1.0
    dg = float(degree) if degree is not None else 3.0

    # bf16 MXU operands only where the math is not cancellation-prone.
    use_bf16 = bool(use_bf16) and metric != "rbf"
    mm_dtype = jnp.bfloat16 if use_bf16 else jnp.float32
    # Constant folding for RBF is only equivalent when gamma > 0.
    fold_rbf = (metric == "rbf") and (g > 0.0)

    # ---- host-side weight prep (one-time, amortized over all N) ----
    sv = support_vectors.astype(jnp.float32)
    sv_norm = jnp.sum(sv * sv, axis=-1).reshape(1, M)             # (1, M)
    svt = sv.T                                                    # (D, M)
    if fold_rbf:
        svt = svt * (2.0 * g)
        sv_norm = sv_norm * (-g)
    svt = svt.astype(mm_dtype)
    alpha = dual_coef.astype(jnp.float32).reshape(1, M)           # lane-major
    b = jnp.asarray(intercept, jnp.float32).reshape(1)            # SMEM scalar

    x_in = x.astype(mm_dtype) if use_bf16 else x                  # keep native width otherwise
    x_item = x_in.dtype.itemsize
    sv_item = jnp.dtype(mm_dtype).itemsize

    # ---- tile selection ----
    # Batch tile: target ~2 MiB of streamed x per buffer (bigger tiles for
    # small D to amortize per-grid-step overhead), 128-aligned so the output
    # tile satisfies the (8, 128) constraint.
    if tile_n is None:
        tn = (2 << 20) // max(1, D * x_item)
        tn = max(128, min(2048, (tn // 128) * 128))
        # keep >= 2 grid steps along N when possible (v7x megacore balance)
        tn = min(tn, max(128, _round_up(-(-N // 2), 128)))
    else:
        tn = max(128, _round_up(int(tile_n), 128))
    n_pad = _round_up(N, tn)

    # Support-vector tile: bound svt tile + (TN,TM) intermediates to ~24 MiB
    # so the kernel fits v7x's 64 MiB VMEM even with double-buffering.
    if tile_m is None:
        budget = 24 << 20
        tm = budget // (16 * tn + 2 * D * sv_item)
        tm = max(128, min((tm // 128) * 128, _round_up(M, 128)))
    else:
        tm = max(128, min(_round_up(int(tile_m), 128), _round_up(M, 128)))
    m_pad = _round_up(M, tm)

    # ---- padding (padded SV columns carry alpha == 0 -> contribute 0) ----
    if n_pad != N:
        x_in = jnp.pad(x_in, ((0, n_pad - N), (0, 0)))
    if m_pad != M:
        svt = jnp.pad(svt, ((0, 0), (0, m_pad - M)))
        sv_norm = jnp.pad(sv_norm, ((0, 0), (0, m_pad - M)))
        alpha = jnp.pad(alpha, ((0, 0), (0, m_pad - M)))

    # ---- explicit VMEM budget (double-buffered tiles + intermediates) ----
    footprint = (2 * tn * D * x_item        # streamed x tiles
                 + 2 * D * tm * sv_item     # streamed svt tiles
                 + 4 * tm * 4               # svn + alpha tiles
                 + 2 * tn * 4               # resident output tile
                 + 4 * tn * tm * 4)         # dots / k / contrib intermediates
    vmem_limit = int(min(max(3 * footprint // 2 + (2 << 20), 16 << 20), 64 << 20))

    kernel = _make_svr_kernel(metric, g, c0, dg, fold_rbf)

    out = pl.pallas_call(
        kernel,
        out_shape=jax.ShapeDtypeStruct((n_pad, 1), jnp.float32),
        grid=(n_pad // tn, m_pad // tm),
        in_specs=[
            pl.BlockSpec((tn, D), lambda i, m: (i, 0)),            # x tile (resident across M steps)
            pl.BlockSpec((D, tm), lambda i, m: (0, m)),            # sv^T tile (pre-scaled for rbf)
            pl.BlockSpec((1, tm), lambda i, m: (0, m)),            # ||sv||^2 tile (pre-scaled for rbf)
            pl.BlockSpec((1, tm), lambda i, m: (0, m)),            # dual coefs, lane-major
            pl.BlockSpec(memory_space=pltpu.MemorySpace.SMEM),     # intercept scalar
        ],
        out_specs=pl.BlockSpec((tn, 1), lambda i, m: (i, 0)),      # f32 accumulator across M
        compiler_params=pltpu.CompilerParams(
            dimension_semantics=("parallel", "arbitrary"),
            vmem_limit_bytes=vmem_limit),
    )(x_in, svt, sv_norm, alpha, b)

    # sklearn/torch-style 1-D prediction
    return out[:N, 0]


def _reference_predict(x, sv, dual_coef, intercept, metric,
                       gamma=None, coef0=None, degree=None):
    """Pure-JAX mirror of Kernel.forward + TorchSVR.predict."""
    D = x.shape[1]
    g = float(gamma) if gamma is not None else 1.0 / D
    c0 = float(coef0) if coef0 is not None else 1.0
    dg = float(degree) if degree is not None else 3.0
    dots = jnp.dot(x, sv.T, precision=jax.lax.Precision.HIGHEST)
    if metric == "linear":
        k = dots
    elif metric in ("poly", "polynomial"):
        k = (g * dots + c0) ** dg
    elif metric == "rbf":
        xn = jnp.sum(x ** 2, axis=-1)[:, None]
        yn = jnp.sum(sv ** 2, axis=-1)[None, :]
        d = jnp.clip(xn + yn - 2.0 * dots, 0.0, None)
        k = jnp.exp(-g * d)
    elif metric == "sigmoid":
        k = jnp.tanh(g * dots + c0)
    else:
        raise ValueError(metric)
    dc = dual_coef.reshape(1, -1)
    return jnp.sum(dc * k, axis=-1) + jnp.asarray(intercept).reshape(-1)[0]


if __name__ == "__main__":
    key = jax.random.PRNGKey(0)

    # (N, D, M, tile_n, tile_m): the second config forces a multi-tile grid on
    # both axes to exercise the M-accumulation path and N/M padding.
    configs = [
        (8, 16, 32, None, None),
        (300, 24, 640, 128, 256),
    ]

    for (N, D, M, tn_, tm_) in configs:
        k1, k2, k3, k4, key = jax.random.split(key, 5)
        x = jax.random.normal(k1, (N, D), jnp.float32) * 0.5
        support_vectors = jax.random.normal(k2, (M, D), jnp.float32) * 0.5
        dual_coef = jax.random.normal(k3, (1, M), jnp.float32)
        intercept = jax.random.normal(k4, (1,), jnp.float32) * 0.1

        for metric in ("rbf", "linear", "poly", "sigmoid"):
            y = torch_svr_predict(x, support_vectors, dual_coef, intercept,
                                  metric=metric, tile_n=tn_, tile_m=tm_)
            y = jax.block_until_ready(y)
            y_ref = _reference_predict(x, support_vectors, dual_coef,
                                       intercept, metric)
            assert y.shape == (N,)
            assert jnp.allclose(y, y_ref, atol=2e-3, rtol=2e-3), \
                f"mismatch vs reference for metric={metric} (N={N}, D={D}, M={M})"

    print("KERNEL_OK")
</pallas_src>

<mosaic_0001>
module attributes {stable_mosaic.version = 11 : i64} {
  func.func @kernel(%arg0: i32, %arg1: i32, %arg2: memref<128x16xf32, #tpu.memory_space<vmem>>, %arg3: memref<16x128xf32, #tpu.memory_space<vmem>>, %arg4: memref<1x128xf32, #tpu.memory_space<vmem>>, %arg5: memref<1x128xf32, #tpu.memory_space<vmem>>, %arg6: memref<1xf32, #tpu.memory_space<smem>>, %arg7: memref<128x1xf32, #tpu.memory_space<vmem>>) attributes {dimension_semantics = [#tpu.dimension_semantics<parallel>, #tpu.dimension_semantics<arbitrary>], iteration_bounds = array<i64: 1, 1>, scalar_prefetch = 0 : i64, scratch_operands = 0 : i64, tpu.core_type = #tpu.core_type<tc>, window_params = [{transform_indices = @transform_0, window_bounds = array<i64: 128, 16>}, {transform_indices = @transform_1, window_bounds = array<i64: 16, 128>}, {transform_indices = @transform_2, window_bounds = array<i64: 1, 128>}, {transform_indices = @transform_3, window_bounds = array<i64: 1, 128>}, {transform_indices = @transform_4, window_bounds = array<i64: 1>}, {transform_indices = @transform_5, window_bounds = array<i64: 128, 1>}]} {
    %c0_i32 = arith.constant 0 : i32
    %0 = arith.cmpi eq, %arg1, %c0_i32 : i32
    %1 = arith.extui %0 : i1 to i32
    %c0_i32_0 = arith.constant 0 : i32
    %2 = arith.cmpi ne, %1, %c0_i32_0 : i32
    scf.if %2 {
      %cst_16 = arith.constant 0.000000e+00 : f32
      %27 = vector.broadcast %cst_16 : f32 to vector<128x1xf32>
      %c0_17 = arith.constant 0 : index
      %28 = memref.load %arg6[%c0_17] : memref<1xf32, #tpu.memory_space<smem>>
      %29 = vector.broadcast %28 : f32 to vector<128x1xf32>
      %30 = arith.addf %27, %29 : vector<128x1xf32>
      %c0_18 = arith.constant 0 : index
      %c0_19 = arith.constant 0 : index
      %31 = vector.load %arg7[%c0_18, %c0_19] : memref<128x1xf32, #tpu.memory_space<vmem>>, vector<128x1xf32>
      tpu.vector_store %arg7[%c0_18, %c0_19], %30 {strides = array<i32>} : memref<128x1xf32, #tpu.memory_space<vmem>>, vector<128x1xf32>,
    } else {
    }
    %c0 = arith.constant 0 : index
    %c0_1 = arith.constant 0 : index
    %3 = vector.load %arg2[%c0, %c0_1] : memref<128x16xf32, #tpu.memory_space<vmem>>, vector<128x16xf32>
    %c0_2 = arith.constant 0 : index
    %c0_3 = arith.constant 0 : index
    %4 = vector.load %arg3[%c0_2, %c0_3] : memref<16x128xf32, #tpu.memory_space<vmem>>, vector<16x128xf32>
    %cst = arith.constant dense<0.000000e+00> : vector<128x128xf32>
    %5 = tpu.matmul %3, %4, %cst {dimension_numbers = #tpu.dot_dimension_numbers<[1], [0], [0], [1], [0, 0, 1, 1], [], []>} : vector<128x16xf32>, vector<16x128xf32>, vector<128x128xf32> -> vector<128x128xf32>
    %6 = arith.mulf %3, %3 : vector<128x16xf32>
    %cst_4 = arith.constant dense<0.000000e+00> : vector<128xf32>
    %7 = vector.multi_reduction <add>, %6, %cst_4 [1] : vector<128x16xf32> to vector<128xf32>
    %8 = vector.shape_cast %7 : vector<128xf32> to vector<128x1xf32>
    %cst_5 = arith.constant -6.250000e-02 : f32
    %9 = vector.broadcast %cst_5 : f32 to vector<128x1xf32>
    %10 = arith.mulf %9, %8 : vector<128x1xf32>
    %c0_6 = arith.constant 0 : index
    %c0_7 = arith.constant 0 : index
    %11 = vector.load %arg4[%c0_6, %c0_7] : memref<1x128xf32, #tpu.memory_space<vmem>>, vector<1x128xf32>
    %12 = vector.broadcast %11 : vector<1x128xf32> to vector<128x128xf32>
    %13 = arith.addf %5, %12 : vector<128x128xf32>
    %14 = vector.broadcast %10 : vector<128x1xf32> to vector<128x128xf32>
    %15 = arith.addf %13, %14 : vector<128x128xf32>
    %cst_8 = arith.constant 0.000000e+00 : f32
    %16 = vector.broadcast %cst_8 : f32 to vector<128x128xf32>
    %17 = arith.minimumf %15, %16 : vector<128x128xf32>
    %18 = math.exp %17 : vector<128x128xf32>
    %c0_9 = arith.constant 0 : index
    %c0_10 = arith.constant 0 : index
    %19 = vector.load %arg5[%c0_9, %c0_10] : memref<1x128xf32, #tpu.memory_space<vmem>>, vector<1x128xf32>
    %20 = vector.broadcast %19 : vector<1x128xf32> to vector<128x128xf32>
    %21 = arith.mulf %18, %20 : vector<128x128xf32>
    %c0_11 = arith.constant 0 : index
    %c0_12 = arith.constant 0 : index
    %22 = vector.load %arg7[%c0_11, %c0_12] : memref<128x1xf32, #tpu.memory_space<vmem>>, vector<128x1xf32>
    %cst_13 = arith.constant dense<0.000000e+00> : vector<128xf32>
    %23 = vector.multi_reduction <add>, %21, %cst_13 [1] : vector<128x128xf32> to vector<128xf32>
    %24 = vector.shape_cast %23 : vector<128xf32> to vector<128x1xf32>
    %25 = arith.addf %22, %24 : vector<128x1xf32>
    %c0_14 = arith.constant 0 : index
    %c0_15 = arith.constant 0 : index
    %26 = vector.load %arg7[%c0_14, %c0_15] : memref<128x1xf32, #tpu.memory_space<vmem>>, vector<128x1xf32>
    tpu.vector_store %arg7[%c0_14, %c0_15], %25 {strides = array<i32>} : memref<128x1xf32, #tpu.memory_space<vmem>>, vector<128x1xf32>,
    return
  }
  func.func @transform_0(%arg0: i32, %arg1: i32) -> (i32, i32) {
    %c0_i32 = arith.constant 0 : i32
    %c0_i32_0 = arith.constant 0 : i32
    return %arg0, %c0_i32 : i32, i32
  }
  func.func @transform_1(%arg0: i32, %arg1: i32) -> (i32, i32) {
    %c0_i32 = arith.constant 0 : i32
    %c0_i32_0 = arith.constant 0 : i32
    return %c0_i32, %arg1 : i32, i32
  }
  func.func @transform_2(%arg0: i32, %arg1: i32) -> (i32, i32) {
    %c0_i32 = arith.constant 0 : i32
    %c0_i32_0 = arith.constant 0 : i32
    return %c0_i32, %arg1 : i32, i32
  }
  func.func @transform_3(%arg0: i32, %arg1: i32) -> (i32, i32) {
    %c0_i32 = arith.constant 0 : i32
    %c0_i32_0 = arith.constant 0 : i32
    return %c0_i32, %arg1 : i32, i32
  }
  func.func @transform_4(%arg0: i32, %arg1: i32) -> i32 {
    %c0_i32 = arith.constant 0 : i32
    %c0_i32_0 = arith.constant 0 : i32
    return %c0_i32 : i32
  }
  func.func @transform_5(%arg0: i32, %arg1: i32) -> (i32, i32) {
    %c0_i32 = arith.constant 0 : i32
    %c0_i32_0 = arith.constant 0 : i32
    return %arg0, %c0_i32 : i32, i32
  }
}

</mosaic_0001>

<bundles_post_ra>
// kernel: tpu_custom_call.1
= control target key start
LH: loop header
LB: loop body
LE: loop exit
PB: predicated region body
PF: predicated region fallthrough
CT: control target
= control target key end

     0   :  { %vm79_vm0 = vcmask 130048   ;;  %vm28_vm1 = vcmask 7168   ;;  %s961_s1 = inlined_call_operand.vmem [shape: f32[16,128], index: 1, kind: input, shape index: {}]   ;;  %s962_s0 = inlined_call_operand.vmem [shape: f32[128,16], index: 0, kind: input, shape index: {}]   ;;  %s963_s4 = inlined_call_operand.<no memory space> [shape: f32[1], index: 4, kind: input, shape index: {}]   ;;  %s964_s5 = inlined_call_operand.vmem [shape: f32[128,1], index: 5, kind: output, shape index: {}]   ;;  %s965_s2 = inlined_call_operand.vmem [shape: f32[1,128], index: 2, kind: input, shape index: {}]   ;;  %s966_s3 = inlined_call_operand.vmem [shape: f32[1,128], index: 3, kind: input, shape index: {}]  }
   0x1   :  { %v61_v0 = vld [vmem:[%s961_s1] sm:$0xff]  ;;  %v62_v1 = vld [vmem:[%s961_s1 + $0x8] sm:$0xff]  ;;  %v47_v7 = vld [vmem:[%s962_s0 + $0x10] sm:$0xff]  ;;  %v26_v51 = vstv %s963_s4 }
   0x2   :  { %v45_v2 = vld [vmem:[%s962_s0] sm:$0xff]  ;;  %v580_v3 = vpack.c.bf16 %v62_v1, %v61_v0  ;;  %v46_v5 = vld [vmem:[%s962_s0 + $0x8] sm:$0xff]  ;;  %v48_v8 = vld [vmem:[%s962_s0 + $0x18] sm:$0xff]  ;;  %v65_v9 = vmul.f32 %v47_v7, %v47_v7  ;;  %30 = vst.msk [vmem:[%s964_s5 + $0x8] sm:$0xff] %vm28_vm1, %v26_v51 }
   0x3   :  { %v63_v4 = vmul.f32 %v45_v2, %v45_v2  ;;  %556 = vmatprep.mubr.msk.f32.mxu0 %vm79_vm0, %v45_v2  ;;  %v53_v6 = vld [vmem:[%s962_s0 + $0x40] sm:$0xff]  ;;  %v64_v10 = vmul.f32 %v46_v5, %v46_v5  ;;  %v66_v12 = vmul.f32 %v48_v8, %v48_v8  ;;  %v54_v13 = vld [vmem:[%s962_s0 + $0x48] sm:$0xff]  ;;  %v55_v17 = vld [vmem:[%s962_s0 + $0x50] sm:$0xff]  ;;  %29 = vst.msk [vmem:[%s964_s5] sm:$0xff] %vm28_vm1, %v26_v51 }
   0x4   :  { %568 = vmatprep.mubr.msk.f32.mxu1 %vm79_vm0, %v53_v6  ;;  %581 = vmatprep.subr.bf16.mxu0 %v580_v3  ;;  %v86_v14 = vsel %vm79_vm0, %v65_v9, 0.0  ;;  %v49_v15 = vld [vmem:[%s962_s0 + $0x20] sm:$0xff]  ;;  %v50_v16 = vld [vmem:[%s962_s0 + $0x28] sm:$0xff]  ;;  %v56_v22 = vld [vmem:[%s962_s0 + $0x58] sm:$0xff]  ;;  %v71_v32 = vmul.f32 %v53_v6, %v53_v6  ;;  %v72_v35 = vmul.f32 %v54_v13, %v54_v13  ;;  %v73_v40 = vmul.f32 %v55_v17, %v55_v17 }
   0x5   :  { %584 = vmatprep.subr.bf16.mxu1 %v580_v3  ;;  %v80_v11 = vsel %vm79_vm0, %v63_v4, 0.0  ;;  %583 = vmatpush3.bf16.msra.mxu0 %v580_v3  ;;  %v89_v18 = vsel %vm79_vm0, %v66_v12, 0.0  ;;  %v83_v19 = vsel %vm79_vm0, %v64_v10, 0.0  ;;  %v68_v20 = vmul.f32 %v50_v16, %v50_v16  ;;  %v51_v23 = vld [vmem:[%s962_s0 + $0x30] sm:$0xff]  ;;  %v52_v24 = vld [vmem:[%s962_s0 + $0x38] sm:$0xff]  ;;  %v57_v25 = vld [vmem:[%s962_s0 + $0x60] sm:$0xff] }
   0x6   :  { %585 = vmatpush3.bf16.msra.mxu1 %v580_v3  ;;  %87 = vadd.xlane.f32.xlu1 %v86_v14  ;;  %v67_v21 = vmul.f32 %v49_v15, %v49_v15  ;;  %v70_v28 = vmul.f32 %v52_v24, %v52_v24  ;;  %v69_v29 = vmul.f32 %v51_v23, %v51_v23  ;;  %v58_v30 = vld [vmem:[%s962_s0 + $0x68] sm:$0xff]  ;;  %v59_v31 = vld [vmem:[%s962_s0 + $0x70] sm:$0xff]  ;;  %v60_v36 = vld [vmem:[%s962_s0 + $0x78] sm:$0xff]  ;;  %v107_v37 = vsel %vm79_vm0, %v72_v35, 0.0 }
   0x7   :  { %81 = vadd.xlane.f32.xlu0 %v80_v11  ;;  %v95_v26 = vsel %vm79_vm0, %v68_v20, 0.0  ;;  %v104_v38 = vsel %vm79_vm0, %v71_v32, 0.0  ;;  %v74_v39 = vmul.f32 %v56_v22, %v56_v22  ;;  %v110_v42 = vsel %vm79_vm0, %v73_v40, 0.0  ;;  %31 = vst.msk [vmem:[%s964_s5 + $0x10] sm:$0xff] %vm28_vm1, %v26_v51  ;;  %32 = vst.msk [vmem:[%s964_s5 + $0x18] sm:$0xff] %vm28_vm1, %v26_v51 }
   0x8   :  { %557 = vmatmul.mubr.msk.f32.vlgmr.msra.gmra.mrb[0].mxu0 %vm79_vm0, %v46_v5  ;;  %v92_v27 = vsel %vm79_vm0, %v67_v21, 0.0  ;;  %v101_v33 = vsel %vm79_vm0, %v70_v28, 0.0  ;;  %v98_v34 = vsel %vm79_vm0, %v69_v29, 0.0  ;;  %v76_v43 = vmul.f32 %v58_v30, %v58_v30  ;;  %33 = vst.msk [vmem:[%s964_s5 + $0x20] sm:$0xff] %vm28_vm1, %v26_v51  ;;  %34 = vst.msk [vmem:[%s964_s5 + $0x28] sm:$0xff] %vm28_vm1, %v26_v51 }
   0x9   :  { %569 = vmatmul.mubr.msk.f32.vlgmr.msra.gmra.mrb[0].mxu1 %vm79_vm0, %v54_v13  ;;  %559 = vmatprep.mubr.msk.f32.mxu0 %vm79_vm0, %v47_v7  ;;  %v113_v41 = vsel %vm79_vm0, %v74_v39, 0.0  ;;  %v75_v44 = vmul.f32 %v57_v25, %v57_v25  ;;  %v78_v47 = vmul.f32 %v60_v36, %v60_v36  ;;  %v77_v48 = vmul.f32 %v59_v31, %v59_v31  ;;  %v808_v62 = vld [vmem:[%s965_s2] ss:$0 sm:$0xff] }
   0xa   :  { %571 = vmatprep.mubr.msk.f32.mxu1 %vm79_vm0, %v55_v17  ;;  %90 = vadd.xlane.f32.xlu1 %v89_v18  ;;  %v119_v45 = vsel %vm79_vm0, %v76_v43, 0.0  ;;  %35 = vst.msk [vmem:[%s964_s5 + $0x30] sm:$0xff] %vm28_vm1, %v26_v51  ;;  %36 = vst.msk [vmem:[%s964_s5 + $0x38] sm:$0xff] %vm28_vm1, %v26_v51 }
   0xb   :  { %84 = vadd.xlane.f32.xlu0 %v83_v19  ;;  %v116_v46 = vsel %vm79_vm0, %v75_v44, 0.0  ;;  %v125_v49 = vsel %vm79_vm0, %v78_v47, 0.0  ;;  %v122_v50 = vsel %vm79_vm0, %v77_v48, 0.0  ;;  %37 = vst.msk [vmem:[%s964_s5 + $0x40] sm:$0xff] %vm28_vm1, %v26_v51  ;;  %38 = vst.msk [vmem:[%s964_s5 + $0x48] sm:$0xff] %vm28_vm1, %v26_v51 }
   0xc   :  { %560 = vmatmul.mubr.msk.f32.gmra.mrb[2].mxu0 %vm79_vm0, %v48_v8  ;;  %39 = vst.msk [vmem:[%s964_s5 + $0x50] sm:$0xff] %vm28_vm1, %v26_v51  ;;  %40 = vst.msk [vmem:[%s964_s5 + $0x58] sm:$0xff] %vm28_vm1, %v26_v51 }
   0xd   :  { %572 = vmatmul.mubr.msk.f32.gmra.mrb[2].mxu1 %vm79_vm0, %v56_v22  ;;  %562 = vmatprep.mubr.msk.f32.mxu0 %vm79_vm0, %v49_v15  ;;  %41 = vst.msk [vmem:[%s964_s5 + $0x60] sm:$0xff] %vm28_vm1, %v26_v51  ;;  %42 = vst.msk [vmem:[%s964_s5 + $0x68] sm:$0xff] %vm28_vm1, %v26_v51 }
   0xe   :  { %574 = vmatprep.mubr.msk.f32.mxu1 %vm79_vm0, %v57_v25  ;;  %96 = vadd.xlane.f32.xlu1 %v95_v26  ;;  %43 = vst.msk [vmem:[%s964_s5 + $0x70] sm:$0xff] %vm28_vm1, %v26_v51  ;;  %44 = vst.msk [vmem:[%s964_s5 + $0x78] sm:$0xff] %vm28_vm1, %v26_v51 }
   0xf   :  { %93 = vadd.xlane.f32.xlu0 %v92_v27 }
  0x10   :  { %563 = vmatmul.mubr.msk.f32.gmra.mrb[4].mxu0 %vm79_vm0, %v50_v16 }
  0x11   :  { %575 = vmatmul.mubr.msk.f32.gmra.mrb[4].mxu1 %vm79_vm0, %v58_v30  ;;  %565 = vmatprep.mubr.msk.f32.mxu0 %vm79_vm0, %v51_v23 }
  0x12   :  { %577 = vmatprep.mubr.msk.f32.mxu1 %vm79_vm0, %v59_v31  ;;  %102 = vadd.xlane.f32.xlu1 %v101_v33 }
  0x13   :  { %99 = vadd.xlane.f32.xlu0 %v98_v34 }
  0x14   :  { %566 = vmatmul.mubr.msk.f32.gmra.mrb[6].mxu0 %vm79_vm0, %v52_v24 }
  0x15   :  { %578 = vmatmul.mubr.msk.f32.gmra.mrb[6].mxu1 %vm79_vm0, %v60_v36 }
  0x16   :  { %108 = vadd.xlane.f32.xlu1 %v107_v37 }
  0x17   :  { %105 = vadd.xlane.f32.xlu0 %v104_v38 }
  0x1a   :  { %114 = vadd.xlane.f32.xlu1 %v113_v41 }
  0x1b   :  { %111 = vadd.xlane.f32.xlu0 %v110_v42 }
  0x1e   :  { %120 = vadd.xlane.f32.xlu1 %v119_v45 }
  0x1f   :  { %117 = vadd.xlane.f32.xlu0 %v116_v46 }
  0x22   :  { %126 = vadd.xlane.f32.xlu1 %v125_v49 }
  0x23   :  { %123 = vadd.xlane.f32.xlu0 %v122_v50 }
  0x93   :  { %v88_v52 = vpop.xlane.xlu1 %87 }
  0x94   :  { %v82_v53 = vpop.xlane.xlu0 %81  ;;  %v130_v5 = vmul.f32 -0.0625, %v88_v52 }
  0x95   :  { %v128_v11 = vmul.f32 -0.0625, %v82_v53 }
  0x97   :  { %v91_v54 = vpop.xlane.xlu1 %90 }
  0x98   :  { %v85_v55 = vpop.xlane.xlu0 %84  ;;  %v131_v12 = vmul.f32 -0.0625, %v91_v54 }
  0x99   :  { %v129_v6 = vmul.f32 -0.0625, %v85_v55 }
  0x9b   :  { %v97_v56 = vpop.xlane.xlu1 %96 }
  0x9c   :  { %v94_v57 = vpop.xlane.xlu0 %93  ;;  %v133_v15 = vmul.f32 -0.0625, %v97_v56 }
  0x9d   :  { %v132_v19 = vmul.f32 -0.0625, %v94_v57 }
  0x9f   :  { %v801_v58 = vpop.xlane.xlu1 %102 }
  0xa0   :  { %v803_v59 = vpop.xlane.xlu0 %99 }
  0xa3   :  { %v109_v60 = vpop.xlane.xlu1 %108 }
  0xa4   :  { %v106_v61 = vpop.xlane.xlu0 %105  ;;  %v137_v63 = vmul.f32 -0.0625, %v109_v60 }
  0xa5   :  { %v136_v4 = vmul.f32 -0.0625, %v106_v61 }
  0xa7   :  { %v115_v0 = vpop.xlane.xlu1 %114 }
  0xa8   :  { %v112_v1 = vpop.xlane.xlu0 %111  ;;  %v139_v18 = vmul.f32 -0.0625, %v115_v0 }
  0xa9   :  { %v138_v24 = vmul.f32 -0.0625, %v112_v1 }
  0xab   :  { %v121_v39 = vpop.xlane.xlu1 %120 }
  0xac   :  { %v118_v40 = vpop.xlane.xlu0 %117  ;;  %v141_v57 = vmul.f32 -0.0625, %v121_v39 }
  0xad   :  { %v140_v0 = vmul.f32 -0.0625, %v118_v40 }
  0xdb   :  { %v558_v2 = vpop.f32.mrb[0].mxu0 }
  0xdc   :  { %v570_v3 = vpop.f32.mrb[0].mxu1  ;;  %v271_v7 = vadd.f32 %v558_v2, %v808_v62  ;;  %v265_v8 = vpop.f32.mrb[1].mxu0 }
  0xdd   :  { %v311_v9 = vadd.f32 %v570_v3, %v808_v62  ;;  %v305_v10 = vpop.f32.mrb[1].mxu1  ;;  %v266_v13 = vadd.f32 %v808_v62, %v265_v8 }
  0xde   :  { %v306_v14 = vadd.f32 %v808_v62, %v305_v10  ;;  %v345_v16 = vadd.f32 %v271_v7, %v129_v6  ;;  %v135_v6 = vmul.f32 -0.0625, %v801_v58  ;;  %v134_v7 = vmul.f32 -0.0625, %v803_v59  ;;  %v127_v10 = vpop.xlane.xlu1 %126  ;;  %v829_v58 = vld [vmem:[%s966_s3] ss:$0 sm:$0xff] }
  0xdf   :  { %v353_v17 = vadd.f32 %v311_v9, %v137_v63  ;;  %v344_v20 = vadd.f32 %v266_v13, %v128_v11  ;;  %v561_v21 = vpop.f32.mrb[2].mxu0 }
  0xe0   :  { %v352_v22 = vadd.f32 %v306_v14, %v136_v4  ;;  %v573_v23 = vpop.f32.mrb[2].mxu1  ;;  %v361_v25 = vmin.f32 %v345_v16, 0.0  ;;  %v281_v27 = vadd.f32 %v561_v21, %v808_v62  ;;  %v275_v28 = vpop.f32.mrb[3].mxu0 }
  0xe1   :  { %v369_v26 = vmin.f32 %v353_v17, 0.0  ;;  %v321_v29 = vadd.f32 %v573_v23, %v808_v62  ;;  %v315_v30 = vpop.f32.mrb[3].mxu1  ;;  %v360_v31 = vmin.f32 %v344_v20, 0.0  ;;  %v276_v33 = vadd.f32 %v808_v62, %v275_v28  ;;  %v124_v14 = vpop.xlane.xlu0 %123 }
  0xe2   :  { %v368_v32 = vmin.f32 %v352_v22, 0.0  ;;  %v316_v34 = vadd.f32 %v808_v62, %v315_v30  ;;  %v378_v35 = vmul.f32 1.442695, %v361_v25  ;;  %v347_v37 = vadd.f32 %v281_v27, %v131_v12 }
  0xe3   :  { %v394_v36 = vmul.f32 1.442695, %v369_v26  ;;  %v355_v38 = vadd.f32 %v321_v29, %v139_v18  ;;  %v376_v41 = vmul.f32 1.442695, %v360_v31  ;;  %v346_v43 = vadd.f32 %v276_v33, %v130_v5  ;;  %v564_v44 = vpop.f32.mrb[4].mxu0 }
  0xe4   :  { %v392_v42 = vmul.f32 1.442695, %v368_v32  ;;  %v354_v45 = vadd.f32 %v316_v34, %v138_v24  ;;  %v576_v46 = vpop.f32.mrb[4].mxu1  ;;  %586 = vpow2.f32 %v378_v35  ;;  %v363_v47 = vmin.f32 %v347_v37, 0.0  ;;  %v285_v49 = vpop.f32.mrb[5].mxu0 }
  0xe5   :  { %v291_v48 = vadd.f32 %v564_v44, %v808_v62  ;;  %v371_v50 = vmin.f32 %v355_v38, 0.0  ;;  %v325_v51 = vpop.f32.mrb[5].mxu1  ;;  %588 = vpow2.f32 %v376_v41  ;;  %v362_v52 = vmin.f32 %v346_v43, 0.0 }
  0xe6   :  { %v286_v53 = vadd.f32 %v808_v62, %v285_v49  ;;  %v370_v54 = vmin.f32 %v354_v45, 0.0  ;;  %590 = vpow2.f32 %v394_v36  ;;  %v382_v55 = vmul.f32 1.442695, %v363_v47 }
  0xe7   :  { %v349_v56 = vadd.f32 %v291_v48, %v133_v15  ;;  %592 = vpow2.f32 %v392_v42  ;;  %v380_v60 = vmul.f32 1.442695, %v362_v52  ;;  %v567_v63 = vpop.f32.mrb[6].mxu0  ;;  %v398_v2 = vmul.f32 1.442695, %v371_v50 }
  0xe8   :  { %v348_v61 = vadd.f32 %v286_v53, %v132_v19  ;;  %v579_v1 = vpop.f32.mrb[6].mxu1  ;;  %v295_v3 = vpop.f32.mrb[7].mxu0  ;;  %v331_v4 = vadd.f32 %v576_v46, %v808_v62  ;;  %v396_v8 = vmul.f32 1.442695, %v370_v54  ;;  %v326_v9 = vadd.f32 %v808_v62, %v325_v51 }
  0xe9   :  { %v335_v5 = vpop.f32.mrb[7].mxu1  ;;  %594 = vpow2.f32 %v382_v55  ;;  %v365_v11 = vmin.f32 %v349_v56, 0.0  ;;  %v301_v12 = vadd.f32 %v567_v63, %v808_v62  ;;  %v296_v16 = vadd.f32 %v808_v62, %v295_v3 }
  0xea   :  { %v357_v13 = vadd.f32 %v331_v4, %v141_v57  ;;  %596 = vpow2.f32 %v380_v60  ;;  %v364_v15 = vmin.f32 %v348_v61, 0.0  ;;  %v356_v17 = vadd.f32 %v326_v9, %v140_v0  ;;  %v432_v9 = vld [vmem:[%s964_s5 + $0x8] sm:$0xff] }
  0xeb   :  { %598 = vpow2.f32 %v398_v2  ;;  %v341_v59 = vadd.f32 %v579_v1, %v808_v62  ;;  %v143_v19 = vmul.f32 -0.0625, %v127_v10  ;;  %v336_v21 = vadd.f32 %v808_v62, %v335_v5  ;;  %v431_v10 = vld [vmem:[%s964_s5] sm:$0xff] }
  0xec   :  { %v373_v18 = vmin.f32 %v357_v13, 0.0  ;;  %600 = vpow2.f32 %v396_v8  ;;  %v372_v20 = vmin.f32 %v356_v17, 0.0  ;;  %v142_v22 = vmul.f32 -0.0625, %v124_v14 }
  0xed   :  { %v386_v24 = vmul.f32 1.442695, %v365_v11  ;;  %v351_v25 = vadd.f32 %v301_v12, %v135_v6  ;;  %v384_v27 = vmul.f32 1.442695, %v364_v15  ;;  %v350_v28 = vadd.f32 %v296_v16, %v134_v7  ;;  %v440_v15 = vld [vmem:[%s964_s5 + $0x48] sm:$0xff]  ;;  %v439_v16 = vld [vmem:[%s964_s5 + $0x40] sm:$0xff] }
  0xee   :  { %v587_v23 = vpop.eup %586  ;;  %v402_v31 = vmul.f32 1.442695, %v373_v18  ;;  %v359_v33 = vadd.f32 %v341_v59, %v143_v19  ;;  %v400_v35 = vmul.f32 1.442695, %v372_v20  ;;  %v358_v62 = vadd.f32 %v336_v21, %v142_v22  ;;  %v434_v19 = vld [vmem:[%s964_s5 + $0x18] sm:$0xff]  ;;  %v433_v20 = vld [vmem:[%s964_s5 + $0x10] sm:$0xff] }
  0xef   :  { %v589_v26 = vpop.eup %588  ;;  %v416_v29 = vmul.f32 %v587_v23, %v829_v58  ;;  %602 = vpow2.f32 %v386_v24  ;;  %v367_v37 = vmin.f32 %v351_v25, 0.0  ;;  %v366_v39 = vmin.f32 %v350_v28, 0.0  ;;  %v442_v25 = vld [vmem:[%s964_s5 + $0x58] sm:$0xff] }
  0xf0   :  { %v591_v30 = vpop.eup %590  ;;  %v415_v32 = vmul.f32 %v589_v26, %v829_v58  ;;  %604 = vpow2.f32 %v384_v27  ;;  %v375_v41 = vmin.f32 %v359_v33, 0.0  ;;  %v374_v43 = vmin.f32 %v358_v62, 0.0  ;;  %v441_v26 = vld [vmem:[%s964_s5 + $0x50] sm:$0xff]  ;;  %v444_v62 = vld [vmem:[%s964_s5 + $0x68] sm:$0xff] }
  0xf1   :  { %v593_v34 = vpop.eup %592  ;;  %449 = vadd.xlane.f32.xlu1 %v416_v29  ;;  %v424_v36 = vmul.f32 %v591_v30, %v829_v58  ;;  %606 = vpow2.f32 %v402_v31  ;;  %v390_v45 = vmul.f32 1.442695, %v367_v37  ;;  %v388_v47 = vmul.f32 1.442695, %v366_v39  ;;  %v436_v31 = vld [vmem:[%s964_s5 + $0x28] sm:$0xff]  ;;  %v443_v37 = vld [vmem:[%s964_s5 + $0x60] sm:$0xff] }
  0xf2   :  { %447 = vadd.xlane.f32.xlu0 %v415_v32  ;;  %v423_v38 = vmul.f32 %v593_v34, %v829_v58  ;;  %608 = vpow2.f32 %v400_v35  ;;  %v406_v49 = vmul.f32 1.442695, %v375_v41  ;;  %v404_v51 = vmul.f32 1.442695, %v374_v43  ;;  %v435_v32 = vld [vmem:[%s964_s5 + $0x20] sm:$0xff]  ;;  %v437_v43 = vld [vmem:[%s964_s5 + $0x30] sm:$0xff] }
  0xf3   :  { %v595_v40 = vpop.eup %594  ;;  %610 = vpow2.f32 %v390_v45 }
  0xf4   :  { %v597_v42 = vpop.eup %596  ;;  %v418_v48 = vmul.f32 %v595_v40, %v829_v58  ;;  %612 = vpow2.f32 %v388_v47 }
  0xf5   :  { %465 = vadd.xlane.f32.xlu1 %v424_v36  ;;  %v599_v44 = vpop.eup %598  ;;  %v417_v50 = vmul.f32 %v597_v42, %v829_v58  ;;  %614 = vpow2.f32 %v406_v49  ;;  %v438_v42 = vld [vmem:[%s964_s5 + $0x38] sm:$0xff]  ;;  %v445_v49 = vld [vmem:[%s964_s5 + $0x70] sm:$0xff] }
  0xf6   :  { %463 = vadd.xlane.f32.xlu0 %v423_v38  ;;  %v601_v46 = vpop.eup %600  ;;  %v426_v52 = vmul.f32 %v599_v44, %v829_v58  ;;  %616 = vpow2.f32 %v404_v51 }
  0xf7   :  { %v425_v53 = vmul.f32 %v601_v46, %v829_v58 }
  0xf9   :  { %453 = vadd.xlane.f32.xlu1 %v418_v48  ;;  %v603_v54 = vpop.eup %602  ;;  %v446_v48 = vld [vmem:[%s964_s5 + $0x78] sm:$0xff] }
  0xfa   :  { %451 = vadd.xlane.f32.xlu0 %v417_v50  ;;  %v605_v55 = vpop.eup %604  ;;  %v420_v60 = vmul.f32 %v603_v54, %v829_v58 }
  0xfb   :  { %v607_v56 = vpop.eup %606  ;;  %v419_v61 = vmul.f32 %v605_v55, %v829_v58 }
  0xfc   :  { %v609_v57 = vpop.eup %608  ;;  %v428_v63 = vmul.f32 %v607_v56, %v829_v58 }
  0xfd   :  { %469 = vadd.xlane.f32.xlu1 %v426_v52  ;;  %v427_v0 = vmul.f32 %v609_v57, %v829_v58  ;;  %v611_v1 = vpop.eup %610 }
  0xfe   :  { %467 = vadd.xlane.f32.xlu0 %v425_v53  ;;  %v613_v2 = vpop.eup %612  ;;  %v422_v5 = vmul.f32 %v611_v1, %v829_v58 }
  0xff   :  { %v615_v3 = vpop.eup %614  ;;  %v421_v6 = vmul.f32 %v613_v2, %v829_v58 }
 0x100   :  { %v617_v4 = vpop.eup %616  ;;  %v430_v7 = vmul.f32 %v615_v3, %v829_v58 }
 0x101   :  { %457 = vadd.xlane.f32.xlu1 %v420_v60  ;;  %v429_v8 = vmul.f32 %v617_v4, %v829_v58 }
 0x102   :  { %455 = vadd.xlane.f32.xlu0 %v419_v61 }
 0x105   :  { %473 = vadd.xlane.f32.xlu1 %v428_v63 }
 0x106   :  { %471 = vadd.xlane.f32.xlu0 %v427_v0 }
 0x109   :  { %461 = vadd.xlane.f32.xlu1 %v422_v5 }
 0x10a   :  { %459 = vadd.xlane.f32.xlu0 %v421_v6 }
 0x10d   :  { %477 = vadd.xlane.f32.xlu1 %v430_v7 }
 0x10e   :  { %475 = vadd.xlane.f32.xlu0 %v429_v8 }
 0x17e   :  { %v450_v11 = vpop.xlane.xlu1 %449 }
 0x17f   :  { %v480_v12 = vadd.f32 %v450_v11, %v432_v9  ;;  %v448_v13 = vpop.xlane.xlu0 %447 }
 0x180   :  { %v479_v14 = vadd.f32 %v448_v13, %v431_v10 }
 0x181   :  { %497 = vst.msk [vmem:[%s964_s5 + $0x8] sm:$0xff] %vm28_vm1, %v480_v12 }
 0x182   :  { %496 = vst.msk [vmem:[%s964_s5] sm:$0xff] %vm28_vm1, %v479_v14  ;;  %v466_v17 = vpop.xlane.xlu1 %465 }
 0x183   :  { %v488_v18 = vadd.f32 %v466_v17, %v440_v15  ;;  %v464_v58 = vpop.xlane.xlu0 %463 }
 0x184   :  { %v487_v59 = vadd.f32 %v464_v58, %v439_v16 }
 0x185   :  { %505 = vst.msk [vmem:[%s964_s5 + $0x48] sm:$0xff] %vm28_vm1, %v488_v18 }
 0x186   :  { %504 = vst.msk [vmem:[%s964_s5 + $0x40] sm:$0xff] %vm28_vm1, %v487_v59  ;;  %v454_v21 = vpop.xlane.xlu1 %453 }
 0x187   :  { %v482_v22 = vadd.f32 %v454_v21, %v434_v19  ;;  %v452_v23 = vpop.xlane.xlu0 %451 }
 0x188   :  { %v481_v24 = vadd.f32 %v452_v23, %v433_v20 }
 0x189   :  { %499 = vst.msk [vmem:[%s964_s5 + $0x18] sm:$0xff] %vm28_vm1, %v482_v22 }
 0x18a   :  { %498 = vst.msk [vmem:[%s964_s5 + $0x10] sm:$0xff] %vm28_vm1, %v481_v24  ;;  %v470_v27 = vpop.xlane.xlu1 %469 }
 0x18b   :  { %v490_v28 = vadd.f32 %v470_v27, %v442_v25  ;;  %v468_v29 = vpop.xlane.xlu0 %467 }
 0x18c   :  { %v489_v30 = vadd.f32 %v468_v29, %v441_v26 }
 0x18d   :  { %507 = vst.msk [vmem:[%s964_s5 + $0x58] sm:$0xff] %vm28_vm1, %v490_v28 }
 0x18e   :  { %506 = vst.msk [vmem:[%s964_s5 + $0x50] sm:$0xff] %vm28_vm1, %v489_v30  ;;  %v458_v33 = vpop.xlane.xlu1 %457 }
 0x18f   :  { %v484_v34 = vadd.f32 %v458_v33, %v436_v31  ;;  %v456_v35 = vpop.xlane.xlu0 %455 }
 0x190   :  { %v483_v36 = vadd.f32 %v456_v35, %v435_v32 }
 0x191   :  { %501 = vst.msk [vmem:[%s964_s5 + $0x28] sm:$0xff] %vm28_vm1, %v484_v34 }
 0x192   :  { %500 = vst.msk [vmem:[%s964_s5 + $0x20] sm:$0xff] %vm28_vm1, %v483_v36  ;;  %v474_v38 = vpop.xlane.xlu1 %473 }
 0x193   :  { %v492_v39 = vadd.f32 %v474_v38, %v444_v62  ;;  %v472_v40 = vpop.xlane.xlu0 %471 }
 0x194   :  { %v491_v41 = vadd.f32 %v472_v40, %v443_v37 }
 0x195   :  { %509 = vst.msk [vmem:[%s964_s5 + $0x68] sm:$0xff] %vm28_vm1, %v492_v39 }
 0x196   :  { %508 = vst.msk [vmem:[%s964_s5 + $0x60] sm:$0xff] %vm28_vm1, %v491_v41  ;;  %v462_v44 = vpop.xlane.xlu1 %461 }
 0x197   :  { %v486_v45 = vadd.f32 %v462_v44, %v438_v42  ;;  %v460_v46 = vpop.xlane.xlu0 %459 }
 0x198   :  { %v485_v47 = vadd.f32 %v460_v46, %v437_v43 }
 0x199   :  { %503 = vst.msk [vmem:[%s964_s5 + $0x38] sm:$0xff] %vm28_vm1, %v486_v45 }
 0x19a   :  { %502 = vst.msk [vmem:[%s964_s5 + $0x30] sm:$0xff] %vm28_vm1, %v485_v47  ;;  %v478_v50 = vpop.xlane.xlu1 %477 }
 0x19b   :  { %v494_v51 = vadd.f32 %v478_v50, %v446_v48  ;;  %v476_v52 = vpop.xlane.xlu0 %475 }
 0x19c   :  { %v493_v53 = vadd.f32 %v476_v52, %v445_v49 }
 0x19d   :  { %511 = vst.msk [vmem:[%s964_s5 + $0x78] sm:$0xff] %vm28_vm1, %v494_v51 }
 0x19e   :  { %510 = vst.msk [vmem:[%s964_s5 + $0x70] sm:$0xff] %vm28_vm1, %v493_v53 }

</bundles_post_ra>
